<compile_context>
chip_gen: v6e
topology: v6e:2x2x1
jax: 0.10.0
libtpu: 0.0.40
codegen_flags: <defaults>
</compile_context>

<pallas_src>
import functools

import jax
import jax.numpy as jnp
import numpy as np
from jax.experimental import pallas as pl
from jax.experimental.pallas import tpu as pltpu


def _sepconv_kernel(x_ref, wc_ref, m_ref, o_ref, xpf_ref, pat_ref, *,
                    C, W, HW, K, pad_eff):
    """One batch element per grid step; stride-1 'same'-padded separable conv.

    x_ref  : (1, C, HW)      flattened NCHW image (H*W on lanes, C on sublanes)
    wc_ref : (Cout, K*K*C)   folded weights  Wc[co, t*C+c] = pw[co,c]*dw[c,t]
    m_ref  : (K, HW)         per-kw column masks (0/1) for W-edge wraparound
    o_ref  : (1, Cout, HW)   lane-dense, NCHW-compatible output block
    xpf_ref: (C, HW+2*off)   f32 scratch: flat image with zero H-halo
    pat_ref: (K*K*C, HW)     f32 scratch: shifted/masked patches ("im2col")
    """
    off = pad_eff * (W + 1)          # flat halo on each side of the image
    if pad_eff > 0:
        # Zero every step (cheap) so the halo is valid on whichever TensorCore
        # this grid step lands on when the batch axis is split across cores.
        xpf_ref[...] = jnp.zeros_like(xpf_ref)
    xpf_ref[:, off:off + HW] = x_ref[0].astype(jnp.float32)

    # Depthwise taps are pure lane shifts of the flat image.  Columns that
    # would wrap across a row boundary (the implicit W padding) are zeroed
    # with the precomputed mask; out-of-range rows read the zero halo.
    for kh in range(K):
        for kw in range(K):
            t = kh * K + kw
            d = (kh - pad_eff) * W + (kw - pad_eff)
            win = xpf_ref[:, off + d:off + d + HW]               # (C, HW)
            pat_ref[t * C:(t + 1) * C, :] = win * m_ref[kw:kw + 1, :]

    # Single MXU matmul: (Cout, K*K*C) x (K*K*C, HW) -> (Cout, HW), lane-dense.
    y = jnp.dot(wc_ref[...], pat_ref[...], preferred_element_type=jnp.float32)
    o_ref[0] = y.astype(o_ref.dtype)


def separable_conv2d(x_nchw, dw_weight, pw_weight, *, stride=1, padding=0,
                     dilation=1):
    """x_nchw: (N,C,H,W); dw_weight: (C,1,K,K); pw_weight: (Cout,C,1,1)."""
    N, C, H, W = x_nchw.shape
    K = dw_weight.shape[-1]
    Cout = pw_weight.shape[0]
    if dilation != 1:
        raise NotImplementedError("dilation != 1 not supported")
    if K % 2 != 1:
        raise NotImplementedError("even kernel_size not supported")
    pad_eff = (K - 1) // 2
    if padding > pad_eff:
        raise NotImplementedError("padding > (K-1)//2 not supported")

    H_out = (H + 2 * padding - K) // stride + 1
    W_out = (W + 2 * padding - K) // stride + 1
    HW = H * W
    off_flat = pad_eff * (W + 1)
    L = HW + 2 * off_flat

    # Free reshape only -- no transpose / padded copy of the input in HBM.
    x_flat = x_nchw.reshape(N, C, HW)

    # Fold depthwise into pointwise: Wc[co, t*C + c] = pw[co,c] * dw[c,kh,kw].
    dw_flat = dw_weight[:, 0, :, :].reshape(C, K * K)                 # (C, K*K)
    pw2d = pw_weight[:, :, 0, 0]                                      # (Cout, C)
    wc = (pw2d[:, None, :] * jnp.transpose(dw_flat)[None, :, :])      # (Cout,K*K,C)
    wc = wc.reshape(Cout, K * K * C).astype(jnp.float32)

    # Column-validity masks per kw tap (host-side constants, tiny).
    w_idx = np.tile(np.arange(W), H)                                  # (HW,)
    mask = np.stack([((w_idx + kw - pad_eff >= 0) &
                      (w_idx + kw - pad_eff < W)) for kw in range(K)])
    mask = jnp.asarray(mask.astype(np.float32))                       # (K, HW)

    kernel = functools.partial(_sepconv_kernel, C=C, W=W, HW=HW, K=K,
                               pad_eff=pad_eff)

    out_flat = pl.pallas_call(
        kernel,
        out_shape=jax.ShapeDtypeStruct((N, Cout, HW), x_nchw.dtype),
        grid_spec=pltpu.PrefetchScalarGridSpec(
            num_scalar_prefetch=0,
            grid=(N,),
            in_specs=[
                pl.BlockSpec((1, C, HW), lambda n: (n, 0, 0)),
                pl.BlockSpec((Cout, K * K * C), lambda n: (0, 0)),
                pl.BlockSpec((K, HW), lambda n: (0, 0)),
            ],
            out_specs=pl.BlockSpec((1, Cout, HW), lambda n: (n, 0, 0)),
            scratch_shapes=[
                pltpu.VMEM((C, L), jnp.float32),
                pltpu.VMEM((K * K * C, HW), jnp.float32),
            ],
        ),
        compiler_params=pltpu.CompilerParams(
            dimension_semantics=("parallel",)),
    )(x_flat, wc, mask)

    # Kernel produces the stride-1 'same'-padded output; the requested
    # stride/padding is a centered (strided) crop -- a cheap XLA slice.
    out1 = out_flat.reshape(N, Cout, H, W)                            # free
    if stride == 1 and padding == pad_eff:
        return out1
    o = pad_eff - padding
    return out1[:, :, o:o + (H_out - 1) * stride + 1:stride,
                      o:o + (W_out - 1) * stride + 1:stride]


def _reference(x_nchw, dw_weight, pw_weight, *, stride, padding):
    """Pure-JAX reference via lax.conv_general_dilated (matches PyTorch Conv2d)."""
    C = x_nchw.shape[1]
    y = jax.lax.conv_general_dilated(
        x_nchw, dw_weight, window_strides=(stride, stride),
        padding=((padding, padding), (padding, padding)),
        dimension_numbers=("NCHW", "OIHW", "NCHW"),
        feature_group_count=C)
    y = jax.lax.conv_general_dilated(
        y, pw_weight, window_strides=(1, 1), padding="VALID",
        dimension_numbers=("NCHW", "OIHW", "NCHW"))
    return y


if __name__ == "__main__":
    # Module config (Xception-style usage): SeparableConv2d(4, 8, 3, stride,
    # padding=1, dilation=1, bias=False).
    N, C, H, W = 2, 4, 16, 16
    Cout, K = 8, 3

    key = jax.random.PRNGKey(0)
    kx, kdw, kpw = jax.random.split(key, 3)
    x = jax.random.normal(kx, (N, C, H, W), dtype=jnp.float32)
    dw_weight = 0.1 * jax.random.normal(kdw, (C, 1, K, K), dtype=jnp.float32)
    pw_weight = 0.1 * jax.random.normal(kpw, (Cout, C, 1, 1), dtype=jnp.float32)

    # Stride-1 block (the main Xception case).
    out = separable_conv2d(x, dw_weight, pw_weight, stride=1, padding=1)
    out = jax.block_until_ready(out)
    ref = _reference(x, dw_weight, pw_weight, stride=1, padding=1)
    np.testing.assert_allclose(np.asarray(out), np.asarray(ref),
                               rtol=1e-5, atol=1e-5)

    # Stride-2 downsampling block (same kernel + output crop in the wrapper).
    out2 = separable_conv2d(x, dw_weight, pw_weight, stride=2, padding=1)
    out2 = jax.block_until_ready(out2)
    ref2 = _reference(x, dw_weight, pw_weight, stride=2, padding=1)
    np.testing.assert_allclose(np.asarray(out2), np.asarray(ref2),
                               rtol=1e-5, atol=1e-5)

    print("KERNEL_OK")
</pallas_src>

<mosaic_0001>
module attributes {stable_mosaic.version = 11 : i64} {
  func.func @_sepconv_kernel(%arg0: i32, %arg1: memref<1x4x256xf32, #tpu.memory_space<vmem>>, %arg2: memref<8x36xf32, #tpu.memory_space<vmem>>, %arg3: memref<3x256xf32, #tpu.memory_space<vmem>>, %arg4: memref<1x8x256xf32, #tpu.memory_space<vmem>>, %arg5: memref<4x290xf32, #tpu.memory_space<vmem>>, %arg6: memref<36x256xf32, #tpu.memory_space<vmem>>) attributes {dimension_semantics = [#tpu.dimension_semantics<parallel>], iteration_bounds = array<i64: 2>, scalar_prefetch = 0 : i64, scratch_operands = 2 : i64, tpu.core_type = #tpu.core_type<tc>, window_params = [{transform_indices = @transform_0, window_bounds = array<i64: 1, 4, 256>}, {pipeline_mode = #tpu.pipeline_mode<synchronous>, transform_indices = @transform_1, window_bounds = array<i64: 8, 36>}, {pipeline_mode = #tpu.pipeline_mode<synchronous>, transform_indices = @transform_2, window_bounds = array<i64: 3, 256>}, {transform_indices = @transform_3, window_bounds = array<i64: 1, 8, 256>}]} {
    %cst = arith.constant 0.000000e+00 : f32
    %0 = vector.broadcast %cst : f32 to vector<4x290xf32>
    %c0 = arith.constant 0 : index
    %c0_0 = arith.constant 0 : index
    %1 = vector.load %arg5[%c0, %c0_0] : memref<4x290xf32, #tpu.memory_space<vmem>>, vector<4x290xf32>
    tpu.vector_store %arg5[%c0, %c0_0], %0 {strides = array<i32>} : memref<4x290xf32, #tpu.memory_space<vmem>>, vector<4x290xf32>,
    %c0_1 = arith.constant 0 : index
    %c0_2 = arith.constant 0 : index
    %c0_3 = arith.constant 0 : index
    %2 = vector.load %arg1[%c0_1, %c0_2, %c0_3] : memref<1x4x256xf32, #tpu.memory_space<vmem>>, vector<1x4x256xf32>
    %3 = vector.shape_cast %2 : vector<1x4x256xf32> to vector<4x256xf32>
    %c0_4 = arith.constant 0 : index
    %c17 = arith.constant 17 : index
    %4 = vector.load %arg5[%c0_4, %c17] : memref<4x290xf32, #tpu.memory_space<vmem>>, vector<4x256xf32>
    tpu.vector_store %arg5[%c0_4, %c17], %3 {strides = array<i32>} : memref<4x290xf32, #tpu.memory_space<vmem>>, vector<4x256xf32>,
    %c0_5 = arith.constant 0 : index
    %c0_6 = arith.constant 0 : index
    %5 = vector.load %arg5[%c0_5, %c0_6] : memref<4x290xf32, #tpu.memory_space<vmem>>, vector<4x256xf32>
    %c0_7 = arith.constant 0 : index
    %c0_8 = arith.constant 0 : index
    %6 = vector.load %arg3[%c0_7, %c0_8] : memref<3x256xf32, #tpu.memory_space<vmem>>, vector<1x256xf32>
    %7 = vector.broadcast %6 : vector<1x256xf32> to vector<4x256xf32>
    %8 = arith.mulf %5, %7 : vector<4x256xf32>
    %c0_9 = arith.constant 0 : index
    %c0_10 = arith.constant 0 : index
    %9 = vector.load %arg6[%c0_9, %c0_10] : memref<36x256xf32, #tpu.memory_space<vmem>>, vector<4x256xf32>
    tpu.vector_store %arg6[%c0_9, %c0_10], %8 {strides = array<i32>} : memref<36x256xf32, #tpu.memory_space<vmem>>, vector<4x256xf32>,
    %c0_11 = arith.constant 0 : index
    %c1 = arith.constant 1 : index
    %10 = vector.load %arg5[%c0_11, %c1] : memref<4x290xf32, #tpu.memory_space<vmem>>, vector<4x256xf32>
    %c1_12 = arith.constant 1 : index
    %c0_13 = arith.constant 0 : index
    %11 = vector.load %arg3[%c1_12, %c0_13] : memref<3x256xf32, #tpu.memory_space<vmem>>, vector<1x256xf32>
    %12 = vector.broadcast %11 : vector<1x256xf32> to vector<4x256xf32>
    %13 = arith.mulf %10, %12 : vector<4x256xf32>
    %c4 = arith.constant 4 : index
    %c0_14 = arith.constant 0 : index
    %14 = vector.load %arg6[%c4, %c0_14] : memref<36x256xf32, #tpu.memory_space<vmem>>, vector<4x256xf32>
    tpu.vector_store %arg6[%c4, %c0_14], %13 {strides = array<i32>} : memref<36x256xf32, #tpu.memory_space<vmem>>, vector<4x256xf32>,
    %c0_15 = arith.constant 0 : index
    %c2 = arith.constant 2 : index
    %15 = vector.load %arg5[%c0_15, %c2] : memref<4x290xf32, #tpu.memory_space<vmem>>, vector<4x256xf32>
    %c2_16 = arith.constant 2 : index
    %c0_17 = arith.constant 0 : index
    %16 = vector.load %arg3[%c2_16, %c0_17] : memref<3x256xf32, #tpu.memory_space<vmem>>, vector<1x256xf32>
    %17 = vector.broadcast %16 : vector<1x256xf32> to vector<4x256xf32>
    %18 = arith.mulf %15, %17 : vector<4x256xf32>
    %c8 = arith.constant 8 : index
    %c0_18 = arith.constant 0 : index
    %19 = vector.load %arg6[%c8, %c0_18] : memref<36x256xf32, #tpu.memory_space<vmem>>, vector<4x256xf32>
    tpu.vector_store %arg6[%c8, %c0_18], %18 {strides = array<i32>} : memref<36x256xf32, #tpu.memory_space<vmem>>, vector<4x256xf32>,
    %c0_19 = arith.constant 0 : index
    %c16 = arith.constant 16 : index
    %20 = vector.load %arg5[%c0_19, %c16] : memref<4x290xf32, #tpu.memory_space<vmem>>, vector<4x256xf32>
    %c0_20 = arith.constant 0 : index
    %c0_21 = arith.constant 0 : index
    %21 = vector.load %arg3[%c0_20, %c0_21] : memref<3x256xf32, #tpu.memory_space<vmem>>, vector<1x256xf32>
    %22 = vector.broadcast %21 : vector<1x256xf32> to vector<4x256xf32>
    %23 = arith.mulf %20, %22 : vector<4x256xf32>
    %c12 = arith.constant 12 : index
    %c0_22 = arith.constant 0 : index
    %24 = vector.load %arg6[%c12, %c0_22] : memref<36x256xf32, #tpu.memory_space<vmem>>, vector<4x256xf32>
    tpu.vector_store %arg6[%c12, %c0_22], %23 {strides = array<i32>} : memref<36x256xf32, #tpu.memory_space<vmem>>, vector<4x256xf32>,
    %c0_23 = arith.constant 0 : index
    %c17_24 = arith.constant 17 : index
    %25 = vector.load %arg5[%c0_23, %c17_24] : memref<4x290xf32, #tpu.memory_space<vmem>>, vector<4x256xf32>
    %c1_25 = arith.constant 1 : index
    %c0_26 = arith.constant 0 : index
    %26 = vector.load %arg3[%c1_25, %c0_26] : memref<3x256xf32, #tpu.memory_space<vmem>>, vector<1x256xf32>
    %27 = vector.broadcast %26 : vector<1x256xf32> to vector<4x256xf32>
    %28 = arith.mulf %25, %27 : vector<4x256xf32>
    %c16_27 = arith.constant 16 : index
    %c0_28 = arith.constant 0 : index
    %29 = vector.load %arg6[%c16_27, %c0_28] : memref<36x256xf32, #tpu.memory_space<vmem>>, vector<4x256xf32>
    tpu.vector_store %arg6[%c16_27, %c0_28], %28 {strides = array<i32>} : memref<36x256xf32, #tpu.memory_space<vmem>>, vector<4x256xf32>,
    %c0_29 = arith.constant 0 : index
    %c18 = arith.constant 18 : index
    %30 = vector.load %arg5[%c0_29, %c18] : memref<4x290xf32, #tpu.memory_space<vmem>>, vector<4x256xf32>
    %c2_30 = arith.constant 2 : index
    %c0_31 = arith.constant 0 : index
    %31 = vector.load %arg3[%c2_30, %c0_31] : memref<3x256xf32, #tpu.memory_space<vmem>>, vector<1x256xf32>
    %32 = vector.broadcast %31 : vector<1x256xf32> to vector<4x256xf32>
    %33 = arith.mulf %30, %32 : vector<4x256xf32>
    %c20 = arith.constant 20 : index
    %c0_32 = arith.constant 0 : index
    %34 = vector.load %arg6[%c20, %c0_32] : memref<36x256xf32, #tpu.memory_space<vmem>>, vector<4x256xf32>
    tpu.vector_store %arg6[%c20, %c0_32], %33 {strides = array<i32>} : memref<36x256xf32, #tpu.memory_space<vmem>>, vector<4x256xf32>,
    %c0_33 = arith.constant 0 : index
    %c32 = arith.constant 32 : index
    %35 = vector.load %arg5[%c0_33, %c32] : memref<4x290xf32, #tpu.memory_space<vmem>>, vector<4x256xf32>
    %c0_34 = arith.constant 0 : index
    %c0_35 = arith.constant 0 : index
    %36 = vector.load %arg3[%c0_34, %c0_35] : memref<3x256xf32, #tpu.memory_space<vmem>>, vector<1x256xf32>
    %37 = vector.broadcast %36 : vector<1x256xf32> to vector<4x256xf32>
    %38 = arith.mulf %35, %37 : vector<4x256xf32>
    %c24 = arith.constant 24 : index
    %c0_36 = arith.constant 0 : index
    %39 = vector.load %arg6[%c24, %c0_36] : memref<36x256xf32, #tpu.memory_space<vmem>>, vector<4x256xf32>
    tpu.vector_store %arg6[%c24, %c0_36], %38 {strides = array<i32>} : memref<36x256xf32, #tpu.memory_space<vmem>>, vector<4x256xf32>,
    %c0_37 = arith.constant 0 : index
    %c33 = arith.constant 33 : index
    %40 = vector.load %arg5[%c0_37, %c33] : memref<4x290xf32, #tpu.memory_space<vmem>>, vector<4x256xf32>
    %c1_38 = arith.constant 1 : index
    %c0_39 = arith.constant 0 : index
    %41 = vector.load %arg3[%c1_38, %c0_39] : memref<3x256xf32, #tpu.memory_space<vmem>>, vector<1x256xf32>
    %42 = vector.broadcast %41 : vector<1x256xf32> to vector<4x256xf32>
    %43 = arith.mulf %40, %42 : vector<4x256xf32>
    %c28 = arith.constant 28 : index
    %c0_40 = arith.constant 0 : index
    %44 = vector.load %arg6[%c28, %c0_40] : memref<36x256xf32, #tpu.memory_space<vmem>>, vector<4x256xf32>
    tpu.vector_store %arg6[%c28, %c0_40], %43 {strides = array<i32>} : memref<36x256xf32, #tpu.memory_space<vmem>>, vector<4x256xf32>,
    %c0_41 = arith.constant 0 : index
    %c34 = arith.constant 34 : index
    %45 = vector.load %arg5[%c0_41, %c34] : memref<4x290xf32, #tpu.memory_space<vmem>>, vector<4x256xf32>
    %c2_42 = arith.constant 2 : index
    %c0_43 = arith.constant 0 : index
    %46 = vector.load %arg3[%c2_42, %c0_43] : memref<3x256xf32, #tpu.memory_space<vmem>>, vector<1x256xf32>
    %47 = vector.broadcast %46 : vector<1x256xf32> to vector<4x256xf32>
    %48 = arith.mulf %45, %47 : vector<4x256xf32>
    %c32_44 = arith.constant 32 : index
    %c0_45 = arith.constant 0 : index
    %49 = vector.load %arg6[%c32_44, %c0_45] : memref<36x256xf32, #tpu.memory_space<vmem>>, vector<4x256xf32>
    tpu.vector_store %arg6[%c32_44, %c0_45], %48 {strides = array<i32>} : memref<36x256xf32, #tpu.memory_space<vmem>>, vector<4x256xf32>,
    %c0_46 = arith.constant 0 : index
    %c0_47 = arith.constant 0 : index
    %50 = vector.load %arg2[%c0_46, %c0_47] : memref<8x36xf32, #tpu.memory_space<vmem>>, vector<8x36xf32>
    %c0_48 = arith.constant 0 : index
    %c0_49 = arith.constant 0 : index
    %51 = vector.load %arg6[%c0_48, %c0_49] : memref<36x256xf32, #tpu.memory_space<vmem>>, vector<36x256xf32>
    %cst_50 = arith.constant dense<0.000000e+00> : vector<8x256xf32>
    %52 = tpu.matmul %50, %51, %cst_50 {dimension_numbers = #tpu.dot_dimension_numbers<[1], [0], [0], [1], [0, 0, 1, 1], [], []>} : vector<8x36xf32>, vector<36x256xf32>, vector<8x256xf32> -> vector<8x256xf32>
    %c0_51 = arith.constant 0 : index
    %c0_52 = arith.constant 0 : index
    %c0_53 = arith.constant 0 : index
    %53 = vector.load %arg4[%c0_51, %c0_52, %c0_53] : memref<1x8x256xf32, #tpu.memory_space<vmem>>, vector<1x8x256xf32>
    %54 = vector.shape_cast %53 : vector<1x8x256xf32> to vector<8x256xf32>
    %55 = vector.shape_cast %52 : vector<8x256xf32> to vector<1x8x256xf32>
    tpu.vector_store %arg4[%c0_51, %c0_52, %c0_53], %55 {strides = array<i32>} : memref<1x8x256xf32, #tpu.memory_space<vmem>>, vector<1x8x256xf32>,
    return
  }
  func.func @transform_0(%arg0: i32) -> (i32, i32, i32) {
    %c0_i32 = arith.constant 0 : i32
    %c0_i32_0 = arith.constant 0 : i32
    %c0_i32_1 = arith.constant 0 : i32
    return %arg0, %c0_i32, %c0_i32_0 : i32, i32, i32
  }
  func.func @transform_1(%arg0: i32) -> (i32, i32) {
    %c0_i32 = arith.constant 0 : i32
    %c0_i32_0 = arith.constant 0 : i32
    %c0_i32_1 = arith.constant 0 : i32
    return %c0_i32, %c0_i32_0 : i32, i32
  }
  func.func @transform_2(%arg0: i32) -> (i32, i32) {
    %c0_i32 = arith.constant 0 : i32
    %c0_i32_0 = arith.constant 0 : i32
    %c0_i32_1 = arith.constant 0 : i32
    return %c0_i32, %c0_i32_0 : i32, i32
  }
  func.func @transform_3(%arg0: i32) -> (i32, i32, i32) {
    %c0_i32 = arith.constant 0 : i32
    %c0_i32_0 = arith.constant 0 : i32
    %c0_i32_1 = arith.constant 0 : i32
    return %arg0, %c0_i32, %c0_i32_0 : i32, i32, i32
  }
}

</mosaic_0001>

<bundles_post_ra>
// kernel: tpu_custom_call.1
= control target key start
LH: loop header
LB: loop body
LE: loop exit
PB: predicated region body
PF: predicated region fallthrough
CT: control target
= control target key end

     0   :  { %8 = vsyncpa [#allocation5], 0  ;;  %s1271_s0 = inlined_call_operand.hbm [shape: f32[2,4,256], index: 0, kind: input, shape index: {}]   ;;  %s1272_s1 = inlined_call_operand.hbm [shape: f32[8,36], index: 1, kind: input, shape index: {}]   ;;  %s1273_s2 = inlined_call_operand.hbm [shape: f32[3,256], index: 2, kind: input, shape index: {}]   ;;  %s1274_s3 = inlined_call_operand.hbm [shape: f32[2,8,256], index: 3, kind: output, shape index: {}]  }
   0x1   :  { %10 = vsyncpa [#allocation5 + $0x1], 0 }
   0x2   :  { %11 = vsyncpa [#allocation8], 0 }
   0x3   :  { %12 = vsyncpa [#allocation6], 0 }
   0x4   :  { %14 = vsyncpa [#allocation6 + $0x1], 0  ;;  %s1055_s12 = smov 0   ;;  %s1057_s13 = smov 0  }
   0x5   :  { %s1059_s14 = smov 0   ;;  %s1061_s15 = smov 0  }
   0x6 LB: > { %s1076_s16 = sadd.s32 4294967295, %s1012_s15   ;;  %s757_s17 = sadd.s32 4294967294, %s1012_s15   ;;  %s1012_s15 = sphi %s1061_s15, %s1296_s15   ;;  %s1008_s14 = sphi %s1059_s14, %s1295_s14   ;;  %s1004_s13 = sphi %s1057_s13, %s1294_s13   ;;  %s1000_s12 = sphi %s1055_s12, %s1293_s12  }
   0x7   : > { %p40_p0 = scmp.ne.s32.totalorder %s1004_s13, %s1000_s12  ;;  %p1275_p1 = scmp.eq.s32.totalorder %s1076_s16, 0 }
   0x8   : > { %p112_p3 = scmp.eq.s32.totalorder %s757_s17, 1  ;;  %p758_p5 = scmp.ge.s32.totalorder %s1012_s15, 1 }
   0x9   : > { %p1085_p4 = por %p1275_p1, %p40_p0  ;;  %p119_p7 = scmp.lt.s32.totalorder %s1012_s15, 3 }
   0xa   : > { %p1090_p6 = por %p112_p3, %p40_p0  ;;  %s1014_s21 = smov [#allocation7]  }
   0xb   : > { %s1279_s18 = scalar_select %p1085_p4, 1, 0 }
   0xc   : > { %s1280_s19 = scalar_select %p1090_p6, 1, 0 }
   0xd   : > { %p1095_p8 = pnand %p758_p5, %p119_p7  ;;  %s132_s22 = sshll.u32 %s1014_s21, 4  ;;  %s133_s22 = int_to_ptr.vmem [resolvable:$true] %s132_s22 }
   0xe   : > { %s1015_s23 = smov [#allocation9]   ;;  %s1109_s26 = sadd.s32 1, %s1012_s15  }
   0xf   : > { %s1281_s20 = scalar_select %p1095_p8, 1, 0 }
  0x10   : > { %p792_p10 = pneg %p1095_p8  ;;  %s143_s24 = sshll.u32 %s1015_s23, 4  ;;  %s144_s24 = int_to_ptr.vmem [resolvable:$true] %s143_s24 }
  0x11   : > { %s24_s27 = ssub.s32 %s1012_s15, %s1109_s26  ;;  %s875_s28 = scalar_lea.vmem %s133_s22, 128 }
  0x12   : > { %p1104_p11 = pnand %p792_p10, %p1275_p1  ;;  %p876_p13 = scmp.ne.s32.totalorder %s133_s22, %s875_s28 }
  0x13   : > { %p883_p5 = scmp.lt.s32.totalorder %s133_s22, %s133_s22  ;;  %p884_p7 = scmp.lt.s32.totalorder %s875_s28, %s875_s28 }
  0x14   : > { %p866_p12 = pneg %p1104_p11 }
  0x15   : > { %p885_p10 = por %p884_p7, %p883_p5 }
  0x16   : > { %p878_p0 = pnand %p876_p13, %p866_p12 }
  0x18   : > { %p879_p3 = pneg %p878_p0 }
  0x1a   : > { %p886_p9 = pnand %p885_p10, %p879_p3 }
  0x1c   : > { %889 = shalt.err (!%p886_p9)
}
  0x1d   : > { %795 = dma.hbm_to_vmem [thread:$0]  (!%p1104_p11), %s1272_s1, 128, %s133_s22, [#allocation8]  }
  0x1e   : > { %s901_s4 = scalar_lea.vmem %s144_s24, 128  ;;  %p909_p13 = scmp.lt.s32.totalorder %s144_s24, %s144_s24 }
  0x1f   : > { %p902_p1 = scmp.ne.s32.totalorder %s144_s24, %s901_s4  ;;  %p910_p0 = scmp.lt.s32.totalorder %s901_s4, %s901_s4 }
  0x21   : > { %p904_p2 = pnand %p902_p1, %p866_p12  ;;  %p911_p4 = por %p910_p0, %p909_p13 }
  0x23   : > { %p905_p6 = pneg %p904_p2 }
  0x25   : > { %p912_p8 = pnand %p911_p4, %p905_p6 }
  0x27   : > { %915 = shalt.err (!%p912_p8)
}
  0x28   : > { %798 = dma.hbm_to_vmem [thread:$0]  (!%p1104_p11), %s1273_s2, 128, %s144_s24, [#allocation8]  }
  0x29   : > { %p25_p1 = scmp.eq.s32.totalorder %s24_s27, 0  ;;  %s27_s7 = sadd.s32 1, %s1008_s14 }
  0x2a   : > { %p34_p2 = scmp.ne.s32.totalorder %s1008_s14, %s1004_s13  ;;  %p35_p4 = scmp.eq.s32.totalorder %s1012_s15, 0 }
  0x2b   : > { %s1136_s8 = scalar_select %p25_p1, %s1008_s14, %s27_s7  }
  0x2c   : > { %p36_p6 = por %p35_p4, %p34_p2  ;;  %p1283_p8 = scmp.eq.s32.totalorder %s1076_s16, 1 }
  0x2d   : > { %p809_p12 = scmp.lt.s32.totalorder %s1012_s15, 2  ;;  %s154_s10 = sand.u32 1, %s1008_s14  }
  0x2e   : > { %p1140_p9 = por %p1283_p8, %p34_p2  ;;  %s762_s11 = sshll.u32 %s154_s10, 3 }
  0x2f   : > { %s778_s17 = sshll.u32 %s1012_s15, 7  ;;  %s158_s24 = scalar_lea.vmem [#allocation4], %s762_s11 }
  0x30   : > { %s1284_s9 = scalar_select %p1140_p9, 1, 0 }
  0x31   : > { %s1150_s23 = scalar_lea.hbm %s1271_s0, %s778_s17  ;;  %s166_s25 = sshll.u32 %s158_s24, 4  ;;  %s167_s25 = int_to_ptr.vmem [resolvable:$true] %s166_s25 }
  0x32   : > { %p1152_p11 = pnand %p809_p12, %p36_p6  ;;  %s155_s28 = scalar_lea.sflag [#allocation5], %s154_s10 }
  0x33   : > { %s916_s29 = scalar_lea.hbm %s1150_s23, 128  ;;  %s921_s5 = scalar_lea.hbm %s1271_s0, 256 }
  0x34   : > { %p917_p3 = scmp.ne.s32.totalorder %s1150_s23, %s916_s29  ;;  %p918_p5 = pneg %p1152_p11 }
  0x35   : > { %p922_p13 = scmp.lt.s32.totalorder %s1150_s23, %s1271_s0  ;;  %p923_p0 = scmp.lt.s32.totalorder %s921_s5, %s916_s29 }
  0x36   : > { %p919_p7 = pnand %p918_p5, %p917_p3 }
  0x37   : > { %p924_p1 = por %p923_p0, %p922_p13 }
  0x38   : > { %p920_p10 = pneg %p919_p7 }
  0x3a   : > { %p925_p2 = pnand %p924_p1, %p920_p10 }
  0x3c   : > { %928 = shalt.err (!%p925_p2)
}
  0x3d   : > { %s929_s11 = scalar_lea.vmem %s167_s25, 128  ;;  %s1016_s10 = smov [#allocation4]  }
  0x3e   : > { %p930_p4 = scmp.ne.s32.totalorder %s167_s25, %s929_s11  ;;  %s934_s17 = sshll.u32 %s1016_s10, 4  ;;  %s935_s17 = int_to_ptr.vmem [resolvable:$false] %s934_s17 }
  0x3f   : > { %s936_s21 = scalar_lea.vmem %s935_s17, 256  ;;  %p937_p12 = scmp.lt.s32.totalorder %s167_s25, %s935_s17 }
  0x40   : > { %p932_p6 = pnand %p930_p4, %p918_p5  ;;  %p938_p3 = scmp.lt.s32.totalorder %s936_s21, %s929_s11 }
  0x42   : > { %p933_p8 = pneg %p932_p6  ;;  %p939_p7 = por %p938_p3, %p937_p12 }
  0x44   : > { %p940_p9 = pnand %p939_p7, %p933_p8 }
  0x46   : > { %943 = shalt.err (!%p940_p9)
}
  0x47   : > { %802 = dma.hbm_to_vmem [thread:$0]  (!%p1152_p11), %s1150_s23, 128, %s167_s25, %s155_s28  }
  0x48   : > { %p1286_p10 = scmp.ne.s32.totalorder %s1281_s20, 0 }
  0x49   : > { %s1173_s22 = sand.u32 (!%p1286_p10), 1, %s1004_s13   ;;  %p1287_p5 = scmp.ne.s32.totalorder (!%p1286_p10), %s1279_s18, 0 }
  0x4a   : > { %175 = sbr.rel (%p1286_p10) target bundleno = 590 (0x24e), region = 32  ;;  %s766_s24 = sshll.u32 (!%p1286_p10), %s1173_s22, 3 }
  0x4b   : > { %s178_s29 = scalar_lea.sflag (!%p1286_p10), [#allocation5], %s1173_s22  ;;  %s181_s30 = scalar_lea.vmem (!%p1286_p10), [#allocation4], %s766_s24 }
  0x4f   : > { %987 = dma.done.wait (%p1287_p5), %s178_s29, 128  }
  0x50   : > { %989 = vsyncadd (%p1287_p5), %s178_s29, 4294967168  ;;  %p1288_p9 = scmp.eq.s32.totalorder %s1076_s16, 0 }
  0x52   : > { %991 = dma.done.wait (%p1288_p9), [#allocation8], 256   ;;  %p1289_p11 = pmov %p1288_p9 }
  0x53   : > { %v233_v0 = vlaneseq  ;;  %vm213_vm0 = vcmask 273408   ;;  %v1017_v1 = vmov 0.0   ;;  %v215_v5 = vld [vmem:[%s181_s30] sm:$0xff]  ;;  %v445_v6 = vld [vmem:[#allocation9] ss:$4 sm:$0x3] }
  0x54   : > { %993 = vsyncadd (%p1289_p11), [#allocation8], 4294967040  ;;  %212 = vst [vmem:[#allocation2] sm:$0xff] %v1017_v1  ;;  %644 = vmatprep.mubr.f32.mxu0 %v1017_v1  ;;  %s1018_s20 = smov 17   ;;  %s1019_s18 = smov 32   ;;  %vm224_vm1 = vcmask 1043592  }
  0x55   : > { %214 = vst.msk [vmem:[#allocation2 + $0x8] sm:$0xf] %vm213_vm0, %v1017_v1  ;;  %v234_v2 = vshrl.u32 %v233_v0, 7  ;;  %217 = vrot.lane.b32.xlu0 %v215_v5, %s1018_s20  ;;  %v522_v9 = vld [vmem:[#allocation9 + $0x2] ss:$4 sm:$0x3] }
  0x56   : > { %v483_v10 = vld [vmem:[#allocation9 + $0x1] ss:$4 sm:$0x3]  ;;  %v406_v16 = vld [vmem:[#allocation9 + $0x2] ss:$4 sm:$0x3] }
  0x57   : > { %v235_v3 = vsub.s32 0, %v234_v2  ;;  %v239_v4 = vsub.s32 1, %v234_v2  ;;  %v369_v15 = vld [vmem:[#allocation9 + $0x1] ss:$4 sm:$0x3]  ;;  %s1020_s23 = smov 34  }
  0x58   : > { %v292_v20 = vld [vmem:[#allocation9 + $0x2] ss:$4 sm:$0x3]  ;;  %v231_v25 = vld [vmem:[#allocation9] ss:$4 sm:$0x3] }
  0x59   : > { %v450_v7 = vrot.slane %v445_v6, %v235_v3  ;;  %v454_v8 = vrot.slane %v445_v6, %v239_v4  ;;  %v527_v11 = vrot.slane %v522_v9, %v235_v3  ;;  %v531_v12 = vrot.slane %v522_v9, %v239_v4  ;;  %v330_v29 = vld [vmem:[#allocation9] ss:$4 sm:$0x3]  ;;  %v252_v30 = vld [vmem:[#allocation9 + $0x1] ss:$4 sm:$0x3] }
  0x5a   : > { %v488_v13 = vrot.slane %v483_v10, %v235_v3  ;;  %v492_v14 = vrot.slane %v483_v10, %v239_v4  ;;  %v374_v18 = vrot.slane %v369_v15, %v235_v3  ;;  %v378_v19 = vrot.slane %v369_v15, %v239_v4  ;;  %s1021_s25 = smov 33   ;;  %s1022_s27 = smov 18  }
  0x5b   : > { %v455_v17 = vcombine.low %v450_v7, %v454_v8  ;;  %v532_v21 = vcombine.low %v527_v11, %v531_v12  ;;  %v411_v23 = vrot.slane %v406_v16, %v235_v3  ;;  %v415_v24 = vrot.slane %v406_v16, %v239_v4  ;;  %s1023_s28 = smov 2   ;;  %s1024_s4 = smov 16  }
  0x5c   : > { %v493_v22 = vcombine.low %v488_v13, %v492_v14  ;;  %v379_v26 = vcombine.low %v374_v18, %v378_v19  ;;  %v297_v27 = vrot.slane %v292_v20, %v235_v3  ;;  %v301_v28 = vrot.slane %v292_v20, %v239_v4  ;;  %s1025_s5 = smov 1   ;;  %s1026_s6 = smov 94  }
  0x5d   : > { %456 = vrot.lane.b32.xlu1 %v455_v17, %s1019_s18  ;;  %533 = vrot.lane.b32.xlu0 %v532_v21, %s1020_s23  ;;  %v236_v31 = vrot.slane %v231_v25, %v235_v3  ;;  %v240_v32 = vrot.slane %v231_v25, %v239_v4  ;;  %v416_v33 = vcombine.low %v411_v23, %v415_v24  ;;  %vm225_vm2 = vcmask 1047556   ;;  %s1027_s7 = smov 96   ;;  %s1028_s11 = smov 111  }
  0x5e   : > { %v335_v34 = vrot.slane %v330_v29, %v235_v3  ;;  %v339_v35 = vrot.slane %v330_v29, %v239_v4  ;;  %v302_v36 = vcombine.low %v297_v27, %v301_v28  ;;  %v257_v37 = vrot.slane %v252_v30, %v235_v3  ;;  %vm226_vm5 = vmor %vm225_vm2, %vm224_vm1  ;;  %s1029_s10 = smov 95   ;;  %s1030_s17 = smov 126  }
  0x5f   : > { %v261_v38 = vrot.slane %v252_v30, %v239_v4  ;;  %v241_v39 = vcombine.low %v236_v31, %v240_v32  ;;  %vm220_vm3 = vcmask 138240   ;;  %vm228_vm4 = vcmask 134144   ;;  %s1031_s21 = smov 110   ;;  %s1032_s24 = smov 112  }
  0x60   : > { %v340_v40 = vcombine.low %v335_v34, %v339_v35  ;;  %vm497_vm6 = vcmask 269312   ;;  %vm459_vm7 = vcmask 261120   ;;  %vm420_vm8 = vcmask 146432   ;;  %s1033_s29 = smov 127   ;;  %s769_s30 = sshll.u32 %s1173_s22, 4 }
  0x61   : > { %494 = vrot.lane.b32.xlu1 %v493_v22, %s1021_s25  ;;  %380 = vrot.lane.b32.xlu0 %v379_v26, %s1018_s20  ;;  %v262_v41 = vcombine.low %v257_v37, %v261_v38  ;;  %vm536_vm9 = vcmask 277504   ;;  %vm344_vm10 = vcmask 130048   ;;  %vm306_vm11 = vcmask 15360   ;;  %s211_s20 = scalar_lea.vmem [#allocation10], %s769_s30  ;;  %s779_s23 = sshll.u32 %s1076_s16, 8 }
  0x62   : > { %vm266_vm12 = vcmask 7168   ;;  %vm513_vm13 = vcmask 777216   ;;  %vm436_vm14 = vcmask 900096   ;;  %vm360_vm15 = vcmask 916480   ;;  %s668_s18 = sshll.u32 %s211_s20, 4  ;;  %p1290_p0 = scmp.ne.s32.totalorder %s1284_s9, 0  ;;  %s1231_s18 = int_to_ptr.vmem [resolvable:$true] %s668_s18 }
  0x63   : > { %vm551_vm0 = vcmask 769024   ;;  %vm474_vm1 = vcmask 785408   ;;  %vm397_vm2 = vcmask 908288   ;;  %s1034_s16 = smov [#allocation10]  }
  0x65   : > { %417 = vrot.lane.b32.xlu1 %v416_v33, %s1022_s27  ;;  %303 = vrot.lane.b32.xlu0 %v302_v36, %s1023_s28  ;;  %s666_s28 = scalar_lea.hbm %s1274_s3, %s779_s23 }
  0x69   : > { %341 = vrot.lane.b32.xlu1 %v340_v40, %s1024_s4  ;;  %263 = vrot.lane.b32.xlu0 %v262_v41, %s1025_s5  ;;  %s654_s4 = scalar_lea.sflag [#allocation6], %s1173_s22  ;;  %s944_s5 = scalar_lea.vmem %s1231_s18, 256 }
  0x6a   : > { %p945_p13 = scmp.ne.s32.totalorder %s1231_s18, %s944_s5 }
  0x6c   : > { %p946_p1 = pnand %p945_p13, %p1290_p0 }
  0x6e   : > { %p947_p2 = pneg %p946_p1 }
  0xc7   : > { %v218_v42 = vpop.permute.xlu0 %217 }
  0xc8   : > { %v219_v43 = vrot.slane %v218_v42, 4 }
  0xca   : > { %v221_v44 = vsel %vm220_vm3, %v219_v43, %v218_v42  ;;  %229 = vst.msk [vmem:[#allocation2 + $0x8] sm:$0xf] %vm228_vm4, %v219_v43  ;;  %vm321_vm4 = vcmask 1031168  }
  0xcb   : > { %227 = vst.msk [vmem:[#allocation2] sm:$0xff] %vm226_vm5, %v221_v44  ;;  %vm282_vm5 = vcmask 1039360  }
  0xcf   : > { %v457_v45 = vpop.permute.xlu1 %456  ;;  %v534_v46 = vpop.permute.xlu0 %533 }
  0xd0   : > { %v458_v48 = vrot.slane %v457_v45, 4  ;;  %v535_v49 = vrot.slane %v534_v46, 4 }
  0xd1   : > { %v444_v52 = vld [vmem:[#allocation2 + $0x8] sm:$0xf] }
  0xd2   : > { %v521_v53 = vld [vmem:[#allocation2 + $0x8] sm:$0xf]  ;;  %v1188_v54 = vld [vmem:[#allocation2] sm:$0xff]  ;;  %v464_v55 = vmul.f32 %v458_v48, %v444_v52  ;;  %v460_v3 = vsel %vm459_vm7, %v458_v48, %v457_v45  ;;  %v537_v11 = vsel %vm536_vm9, %v535_v49, %v534_v46 }
  0xd3   : > { %v495_v47 = vpop.permute.xlu1 %494  ;;  %v381_v51 = vpop.permute.xlu0 %380  ;;  %v541_v56 = vmul.f32 %v535_v49, %v521_v53  ;;  %v368_v58 = vld [vmem:[#allocation2 + $0x8] sm:$0xf]  ;;  %v243_v62 = vmul.f32 %v241_v39, %v1188_v54  ;;  %v463_v6 = vmul.f32 %v460_v3, %v1188_v54  ;;  %v540_v12 = vmul.f32 %v537_v11, %v1188_v54 }
  0xd4   : > { %v496_v50 = vrot.slane %v495_v47, 4  ;;  %v382_v59 = vrot.slane %v381_v51, 4  ;;  %472 = vrot.lane.b32.xlu1 %v464_v55, %s1027_s7  ;;  %v290_v4 = vld [vmem:[#allocation2 + $0x8] sm:$0xf] }
  0xd5   : > { %549 = vrot.lane.b32.xlu0 %v541_v56, %s1026_s6  ;;  %247 = vst [vmem:[#allocation3 + $0x30] sm:$0xf] %v243_v62  ;;  %v245_v5 = vcombine.high %v243_v62, %v243_v62  ;;  %v482_v8 = vld [vmem:[#allocation2 + $0x8] sm:$0xf]  ;;  %v544_v33 = vcombine.high %v540_v12, %v540_v12  ;;  %v467_v35 = vcombine.high %v463_v6, %v463_v6 }
  0xd6   : > { %v498_v57 = vsel %vm497_vm6, %v496_v50, %v495_v47  ;;  %v387_v0 = vmul.f32 %v382_v59, %v368_v58  ;;  %v502_v13 = vmul.f32 %v496_v50, %v482_v8  ;;  %v383_v15 = vsel %vm220_vm3, %v382_v59, %v381_v51  ;;  %v405_v17 = vld [vmem:[#allocation2 + $0x8] sm:$0xf] }
  0xd7   : > { %v418_v60 = vpop.permute.xlu1 %417  ;;  %v304_v61 = vpop.permute.xlu0 %303  ;;  %v1194_v63 = vmul.f32 %v498_v57, %v1188_v54  ;;  %248 = vst [vmem:[#allocation3] sm:$0xf] %v245_v5  ;;  %v386_v18 = vmul.f32 %v383_v15, %v1188_v54  ;;  %v329_v23 = vld [vmem:[#allocation2 + $0x8] sm:$0xf]  ;;  %vm573_vm3 = vcmask 1043456   ;;  %vm569_vm6 = vcmask 293888  }
  0xd8   : > { %v305_v1 = vrot.slane %v304_v61, 4  ;;  %v419_v2 = vrot.slane %v418_v60, 4  ;;  %395 = vrot.lane.b32.xlu1 %v387_v0, %s1028_s11  ;;  %v506_v20 = vcombine.low %v502_v13, %v502_v13  ;;  %v250_v38 = vld [vmem:[#allocation2 + $0x8] sm:$0xf] }
  0xd9   : > { %509 = vrot.lane.b32.xlu0 %v1194_v63, %s1029_s10  ;;  %v505_v34 = vcombine.low %v1194_v63, %v1194_v63  ;;  %v390_v37 = vcombine.high %v386_v18, %v386_v18 }
  0xda   : > { %v311_v7 = vmul.f32 %v305_v1, %v290_v4  ;;  %v421_v9 = vsel %vm420_vm8, %v419_v2, %v418_v60  ;;  %v425_v19 = vmul.f32 %v419_v2, %v405_v17  ;;  %v307_v27 = vsel %vm306_vm11, %v305_v1, %v304_v61 }
  0xdb   : > { %v342_v10 = vpop.permute.xlu1 %341  ;;  %v424_v14 = vmul.f32 %v421_v9, %v1188_v54  ;;  %v264_v22 = vpop.permute.xlu0 %263  ;;  %v310_v29 = vmul.f32 %v307_v27, %v1188_v54 }
  0xdc   : > { %319 = vrot.lane.b32.xlu1 %v311_v7, %s1030_s17  ;;  %v343_v16 = vrot.slane %v342_v10, 4  ;;  %v429_v26 = vcombine.low %v425_v19, %v425_v19  ;;  %v265_v28 = vrot.slane %v264_v22, 4 }
  0xdd   : > { %468 = vrot.lane.b32.xlu0 %v463_v6, %s1027_s7  ;;  %v428_v36 = vcombine.low %v424_v14, %v424_v14  ;;  %v314_v41 = vcombine.high %v310_v29, %v310_v29 }
  0xde   : > { %v345_v21 = vsel %vm344_vm10, %v343_v16, %v342_v10  ;;  %v349_v25 = vmul.f32 %v343_v16, %v329_v23  ;;  %v267_v31 = vsel %vm266_vm12, %v265_v28, %v264_v22  ;;  %v271_v39 = vmul.f32 %v265_v28, %v250_v38 }
  0xdf   : > { %v348_v24 = vmul.f32 %v345_v21, %v1188_v54  ;;  %v270_v32 = vmul.f32 %v267_v31, %v1188_v54 }
  0xe0   : > { %545 = vrot.lane.b32.xlu1 %v540_v12, %s1026_s6  ;;  %v353_v30 = vcombine.low %v349_v25, %v349_v25  ;;  %v275_v42 = vcombine.low %v271_v39, %v271_v39 }
  0xe1   : > { %432 = vrot.lane.b32.xlu0 %v424_v14, %s1031_s21  ;;  %v352_v40 = vcombine.low %v348_v24, %v348_v24  ;;  %v274_v43 = vcombine.low %v270_v32, %v270_v32 }
  0xe4   : > { %511 = vrot.lane.b32.xlu1 %v506_v20, %s1029_s10 }
  0xe5   : > { %391 = vrot.lane.b32.xlu0 %v386_v18, %s1028_s11 }
  0xe8   : > { %434 = vrot.lane.b32.xlu1 %v429_v26, %s1031_s21 }
  0xe9   : > { %356 = vrot.lane.b32.xlu0 %v348_v24, %s1032_s24 }
  0xec   : > { %358 = vrot.lane.b32.xlu1 %v353_v30, %s1032_s24  ;;  %v558_v30 = vld [vmem:[#allocation7] sm:$0xff] }
  0xed   : > { %315 = vrot.lane.b32.xlu0 %v310_v29, %s1030_s17 }
  0xf0   : > { %547 = vrot.lane.b32.xlu1 %v544_v33, %s1026_s6  ;;  %s948_s6 = sshll.u32 %s1034_s16, 4  ;;  %s949_s6 = int_to_ptr.vmem [resolvable:$false] %s948_s6 }
  0xf1   : > { %278 = vrot.lane.b32.xlu0 %v270_v32, %s1033_s29  ;;  %p951_p4 = scmp.lt.s32.totalorder %s1231_s18, %s949_s6 }
  0xf4   : > { %507 = vrot.lane.b32.xlu1 %v505_v34, %s1029_s10 }
  0xf5   : > { %470 = vrot.lane.b32.xlu0 %v467_v35, %s1027_s7  ;;  %s950_s7 = scalar_lea.vmem %s949_s6, 512 }
  0xf6   : > { %p952_p6 = scmp.lt.s32.totalorder %s950_s7, %s944_s5 }
  0xf8   : > { %430 = vrot.lane.b32.xlu1 %v428_v36, %s1031_s21  ;;  %p953_p8 = por %p952_p6, %p951_p4 }
  0xf9   : > { %393 = vrot.lane.b32.xlu0 %v390_v37, %s1028_s11 }
  0xfa   : > { %p954_p12 = pnand %p953_p8, %p947_p2 }
  0xfc   : > { %354 = vrot.lane.b32.xlu1 %v352_v40, %s1032_s24 }
  0xfd   : > { %317 = vrot.lane.b32.xlu0 %v314_v41, %s1030_s17 }
 0x100   : > { %280 = vrot.lane.b32.xlu1 %v275_v42, %s1033_s29 }
 0x101   : > { %276 = vrot.lane.b32.xlu0 %v274_v43, %s1033_s29 }
 0x146   : > { %v473_v45 = vpop.permute.xlu1 %472 }
 0x147   : > { %v550_v44 = vpop.permute.xlu0 %549 }
 0x14a   : > { %v396_v46 = vpop.permute.xlu1 %395 }
 0x14b   : > { %v510_v47 = vpop.permute.xlu0 %509 }
 0x14e   : > { %v320_v48 = vpop.permute.xlu1 %319 }
 0x14f   : > { %v469_v49 = vpop.permute.xlu0 %468 }
 0x152   : > { %v546_v50 = vpop.permute.xlu1 %545 }
 0x153   : > { %v433_v51 = vpop.permute.xlu0 %432 }
 0x156   : > { %v512_v52 = vpop.permute.xlu1 %511 }
 0x157   : > { %v392_v53 = vpop.permute.xlu0 %391  ;;  %v515_v54 = vsel %vm513_vm13, %v510_v47, %v512_v52 }
 0x158   : > { %519 = vst [vmem:[#allocation3 + $0x20] sm:$0xf0] %v515_v54 }
 0x15a   : > { %v435_v55 = vpop.permute.xlu1 %434 }
 0x15b   : > { %v357_v56 = vpop.permute.xlu0 %356  ;;  %v438_v57 = vsel %vm436_vm14, %v433_v51, %v435_v55 }
 0x15c   : > { %442 = vst [vmem:[#allocation3 + $0x28] sm:$0xf0] %v438_v57 }
 0x15e   : > { %v359_v58 = vpop.permute.xlu1 %358 }
 0x15f   : > { %v316_v59 = vpop.permute.xlu0 %315  ;;  %v362_v60 = vsel %vm360_vm15, %v357_v56, %v359_v58 }
 0x160   : > { %366 = vst [vmem:[#allocation3 + $0x10] sm:$0xf0] %v362_v60 }
 0x162   : > { %v548_v61 = vpop.permute.xlu1 %547 }
 0x163   : > { %v279_v62 = vpop.permute.xlu0 %278  ;;  %v552_v63 = vsel %vm551_vm0, %v546_v50, %v548_v61  ;;  %v553_v0 = vsel %vm551_vm0, %v548_v61, %v550_v44 }
 0x164   : > { %556 = vst [vmem:[#allocation3 + $0x40] sm:$0xf] %v552_v63  ;;  %557 = vst [vmem:[#allocation3 + $0x38] sm:$0xf] %v553_v0 }
 0x166   : > { %v508_v1 = vpop.permute.xlu1 %507 }
 0x167   : > { %v471_v2 = vpop.permute.xlu0 %470  ;;  %v514_v3 = vsel %vm513_vm13, %v508_v1, %v510_v47 }
 0x168   : > { %v475_v4 = vsel %vm474_vm1, %v469_v49, %v471_v2  ;;  %v476_v5 = vsel %vm474_vm1, %v471_v2, %v473_v45  ;;  %518 = vst [vmem:[#allocation3 + $0x8] sm:$0xf0] %v514_v3 }
 0x169   : > { %479 = vst [vmem:[#allocation3 + $0x8] sm:$0xf] %v475_v4  ;;  %480 = vst [vmem:[#allocation3 + $0x20] sm:$0xf] %v476_v5 }
 0x16a   : > { %v431_v6 = vpop.permute.xlu1 %430 }
 0x16b   : > { %v394_v7 = vpop.permute.xlu0 %393  ;;  %v437_v8 = vsel %vm436_vm14, %v431_v6, %v433_v51  ;;  %v568_v11 = vld [vmem:[#allocation3 + $0x38] sm:$0xf]  ;;  %v567_v12 = vld [vmem:[#allocation3 + $0x40] sm:$0xf] }
 0x16c   : > { %v398_v9 = vsel %vm397_vm2, %v392_v53, %v394_v7  ;;  %v399_v10 = vsel %vm397_vm2, %v394_v7, %v396_v46  ;;  %441 = vst [vmem:[#allocation3 + $0x48] sm:$0xf0] %v437_v8  ;;  %770 = vmatprep.subr.msk.mxu0 %vm573_vm3, %v568_v11 }
 0x16d   : > { %402 = vst [vmem:[#allocation3 + $0x48] sm:$0xf] %v398_v9  ;;  %403 = vst [vmem:[#allocation3 + $0x28] sm:$0xf] %v399_v10  ;;  %771 = vmatpush1.msk.msra.mxu0 %vm573_vm3, %v567_v12 }
 0x16e   : > { %v355_v13 = vpop.permute.xlu1 %354 }
 0x16f   : > { %v318_v14 = vpop.permute.xlu0 %317  ;;  %v361_v15 = vsel %vm360_vm15, %v355_v13, %v357_v56 }
 0x170   : > { %v322_v16 = vsel %vm321_vm4, %v316_v59, %v318_v14  ;;  %v323_v17 = vsel %vm321_vm4, %v318_v14, %v320_v48  ;;  %v566_v18 = vld [vmem:[#allocation3 + $0x20] sm:$0xff]  ;;  %v565_v19 = vld [vmem:[#allocation3 + $0x8] sm:$0xff]  ;;  %365 = vst [vmem:[#allocation3 + $0x18] sm:$0xf0] %v361_v15 }
 0x171   : > { %326 = vst [vmem:[#allocation3 + $0x18] sm:$0xf] %v322_v16  ;;  %327 = vst [vmem:[#allocation3 + $0x10] sm:$0xf] %v323_v17  ;;  %604 = vmatprep.subr.mxu0 %v566_v18 }
 0x172   : > { %605 = vmatpush1.msra.mxu0 %v565_v19  ;;  %v281_v20 = vpop.permute.xlu1 %280 }
 0x173   : > { %v277_v21 = vpop.permute.xlu0 %276  ;;  %v284_v22 = vsel %vm282_vm5, %v279_v62, %v281_v20 }
 0x174   : > { %v283_v23 = vsel %vm282_vm5, %v277_v21, %v279_v62  ;;  %v564_v24 = vld [vmem:[#allocation3 + $0x28] sm:$0xff]  ;;  %288 = vst [vmem:[#allocation3] sm:$0xf0] %v284_v22 }
 0x175   : > { %v563_v25 = vld [vmem:[#allocation3 + $0x48] sm:$0xff]  ;;  %287 = vst [vmem:[#allocation3 + $0x30] sm:$0xf0] %v283_v23  ;;  %606 = vmatprep.subr.mxu0 %v564_v24 }
 0x176   : > { %607 = vmatpush1.msra.mxu0 %v563_v25 }
 0x178   : > { %v562_v26 = vld [vmem:[#allocation3 + $0x10] sm:$0xff]  ;;  %v561_v27 = vld [vmem:[#allocation3 + $0x18] sm:$0xff] }
 0x179   : > { %608 = vmatprep.subr.mxu0 %v562_v26 }
 0x17a   : > { %609 = vmatpush1.msra.mxu0 %v561_v27 }
 0x17b   : > { %v560_v28 = vld [vmem:[#allocation3] sm:$0xff] }
 0x17c   : > { %v559_v29 = vld [vmem:[#allocation3 + $0x30] sm:$0xff]  ;;  %610 = vmatprep.subr.mxu0 %v560_v28 }
 0x17d   : > { %611 = vmatpush1.msra.mxu0 %v559_v29 }
 0x17e   : > { %772 = vmatmul.mubr.msk.f32.vlgmr.msra.gmra.mxu0 %vm569_vm6, %v558_v30 }
 0x23e   : > { %v646_v31 = vpop.f32.mrf.mxu0 }
 0x23f   : > { %651 = vst [vmem:[%s211_s20] sm:$0xff] %v646_v31 }
 0x240   : > { %v648_v32 = vpop.f32.mrf.mxu0 }
 0x241   : > { %652 = vst [vmem:[%s211_s20 + $0x8] sm:$0xff] %v648_v32 }
 0x242   : > { %957 = shalt.err (!%p954_p12)
}
 0x243   : > { %s958_s11 = scalar_lea.hbm %s666_s28, 256  ;;  %s962_s17 = scalar_lea.hbm %s1274_s3, 512 }
 0x244   : > { %p959_p3 = scmp.ne.s32.totalorder %s666_s28, %s958_s11  ;;  %p963_p5 = scmp.lt.s32.totalorder %s666_s28, %s1274_s3 }
 0x245   : > { %p964_p9 = scmp.lt.s32.totalorder %s962_s17, %s958_s11 }
 0x246   : > { %p960_p7 = pnand %p959_p3, %p1290_p0 }
 0x247   : > { %p965_p11 = por %p964_p9, %p963_p5 }
 0x248   : > { %p961_p10 = pneg %p960_p7 }
 0x24a   : > { %p966_p13 = pnand %p965_p11, %p961_p10 }
 0x24c   : > { %969 = shalt.err (!%p966_p13)
}
 0x24d   : > { %790 = dma.vmem_to_hbm [thread:$0]  (%p1290_p0), %s1231_s18, 256, %s666_s28, %s654_s4  }
 0x24e PF: > { %s680_s29 = sand.u32 1, %s1000_s12   ;;  %p1291_p1 = scmp.ne.s32.totalorder %s1280_s19, 0 }
 0x24f   : > { %p1292_p2 = scmp.ge.s32.totalorder %s1012_s15, 2  ;;  %s681_s30 = scalar_lea.sflag [#allocation6], %s680_s29 }
 0x251   : > { %p804_p4 = pnand %p1292_p2, %p1291_p1 }
 0x253   : > { %p805_p6 = pneg %p804_p4 }
 0x255   : > { %995 = dma.done.wait (%p805_p6), %s681_s30, 256  }
 0x256   : > { %997 = vsyncadd (%p805_p6), %s681_s30, 4294967040  ;;  %p17_p8 = scmp.ge.s32.totalorder %s1109_s26, 4   ;;  %s1293_s12 = smov %s1004_s13 }
 0x257   : > { %s1294_s13 = smov %s1008_s14  ;;  %s1295_s14 = smov %s1136_s8 }
 0x258   : > { %s1296_s15 = smov %s1109_s26  ;;  %19 = sbr.rel (!%p17_p8) target bundleno = 6 (0x6), region = 87 }
 0x25d   :  { %686 = vsyncpa [#allocation5], 1 }
 0x25e   :  { %688 = vsyncpa [#allocation5 + $0x1], 1 }
 0x25f   :  { %689 = vsyncpa [#allocation8], 1 }
 0x260   :  { %690 = vsyncpa [#allocation6], 1 }
 0x261   :  { %692 = vsyncpa [#allocation6 + $0x1], 1 }

</bundles_post_ra>
